<compile_context>
chip_gen: v7x
topology: tpu7x:2x2x1
jax: 0.10.0
libtpu: 0.0.40
codegen_flags: <defaults>
</compile_context>

<pallas_src>
import functools

import jax
import jax.numpy as jnp
from jax.experimental import pallas as pl
from jax.experimental.pallas import tpu as pltpu

EPS = 1e-5  # nn.BatchNorm2d default eps


def _band3x3(w_oihw, width):
    """(Cout,Cin,3,3) OIHW weights -> (3, W*Cin, W*Cout) banded matrices.

    B[ky][(wx, ci), (w, co)] = w[co, ci, ky, wx - w + 1] when |wx - w| <= 1,
    else 0, so one matmul per ky tap implements all kx taps plus the 'same'
    zero padding along the width axis.
    """
    w = jnp.transpose(w_oihw, (2, 3, 1, 0))                 # (3,3,Cin,Cout)
    cin, cout = w.shape[2], w.shape[3]
    wx = jnp.arange(width)[:, None]                         # source width idx
    wo = jnp.arange(width)[None, :]                         # output width idx
    kx = wx - wo + 1                                        # (W, W)
    valid = ((kx >= 0) & (kx < 3)).astype(w.dtype)
    taps = w[:, jnp.clip(kx, 0, 2)]                         # (3, W, W, Cin, Cout)
    taps = taps * valid[None, :, :, None, None]
    taps = jnp.transpose(taps, (0, 1, 3, 2, 4))             # (3, wx, ci, w, co)
    return taps.reshape(3, width * cin, width * cout)


def _band1x1(w_oi11, width):
    """(Cout,Cin,1,1) 1x1 conv weights -> block-diagonal (W*Cin, W*Cout)."""
    wm = jnp.transpose(w_oi11[:, :, 0, 0], (1, 0))          # (Cin, Cout)
    eye = jnp.eye(width, dtype=wm.dtype)
    m = jnp.einsum('ab,ij->aibj', eye, wm)                  # (wx, ci, w, co)
    return m.reshape(width * wm.shape[0], width * wm.shape[1])


def _basic_block_kernel(xp_ref, w1b_ref, g1t_ref, b1t_ref,
                        w2b_ref, g2t_ref, b2t_ref, wscb_ref,
                        out_ref, hpad_ref, *, cmid):
    # xp_ref  : (N, H+2, W*Cin)   bf16 height-padded input, lanes = (w, ci)
    # w1b_ref : (3, W*Cin, W*Cmid)  bf16 banded conv1 weights (one per ky)
    # g1t/b1t : (1, W*Cmid)       f32 bn1 gamma/beta tiled across W groups
    # w2b_ref : (3, W*Cmid, W*Cmid) bf16 banded conv2 weights
    # g2t/b2t : (1, W*Cmid)       f32 bn2 gamma/beta tiled across W groups
    # wscb_ref: (W*Cin, W*Cmid)   bf16 block-diagonal 1x1 shortcut weights
    # out_ref : (N*H, W*Cmid)     f32 lane-dense output
    # hpad_ref: (N, H+2, W*Cmid)  bf16 scratch: height-padded intermediate
    N, Hp, WCin = xp_ref.shape
    H = Hp - 2
    NH = N * H
    WCmid = out_ref.shape[-1]
    width = WCmid // cmid
    inv_cnt = 1.0 / float(NH * width)

    def banded_conv(src_ref, wb_ref, kdim):
        # 'same' 3x3 conv, stride 1: three lane-dense MXU matmuls (one per
        # ky), bf16 operands, f32 accumulation into a (NH, W*Cmid) tile.
        acc = jnp.zeros((NH, WCmid), jnp.float32)
        for ky in range(3):
            a = src_ref[:, ky:ky + H, :].reshape(NH, kdim)
            acc = acc + jax.lax.dot_general(
                a, wb_ref[ky], (((1,), (0,)), ((), ())),
                preferred_element_type=jnp.float32)
        return acc

    def channel_sum(v):
        # v: (1, W*Cmid) per-lane sums.  Log-tree of lane rotations leaves
        # every lane holding the total of its channel (lane % cmid), already
        # replicated across the W groups -- no reshape / tile needed.
        shift = cmid
        while shift < WCmid:
            v = v + pltpu.roll(v, shift=shift, axis=1)
            shift *= 2
        return v

    def bn_affine(y, g_ref, b_ref):
        # Training-mode BN (biased batch variance) fused into one affine.
        s1 = channel_sum(jnp.sum(y, axis=0, keepdims=True))
        s2 = channel_sum(jnp.sum(y * y, axis=0, keepdims=True))
        mean = s1 * inv_cnt
        var = s2 * inv_cnt - mean * mean
        scale = g_ref[...] * jax.lax.rsqrt(var + EPS)
        shift = b_ref[...] - mean * scale
        return y * scale + shift

    # ---- conv1 (3x3, stride 1, pad 1) + bn1 + relu ----
    h1 = jnp.maximum(bn_affine(banded_conv(xp_ref, w1b_ref, WCin),
                               g1t_ref, b1t_ref), 0.0)

    # ---- height-padded intermediate: zero only the halo rows, write the
    #      interior exactly once (bf16 for the next MXU pass) ----
    hpad_ref[:, 0:1, :] = jnp.zeros((N, 1, WCmid), hpad_ref.dtype)
    hpad_ref[:, H + 1:H + 2, :] = jnp.zeros((N, 1, WCmid), hpad_ref.dtype)
    hpad_ref[:, 1:1 + H, :] = h1.astype(hpad_ref.dtype).reshape(N, H, WCmid)

    # ---- conv2 (3x3, stride 1, pad 1) + bn2 ----
    y2 = bn_affine(banded_conv(hpad_ref, w2b_ref, WCmid), g2t_ref, b2t_ref)

    # ---- 1x1 shortcut on the original input, fused residual add + relu ----
    xc = xp_ref[:, 1:1 + H, :].reshape(NH, WCin)
    sc = jax.lax.dot_general(xc, wscb_ref[...], (((1,), (0,)), ((), ())),
                             preferred_element_type=jnp.float32)
    out_ref[...] = jnp.maximum(y2 + sc, 0.0)

    # TODO(synk): se_mode branches (se1/se2 squeeze-excite) and stride>1 /
    # dilation>1 variants are not exercised in this configuration and are not
    # implemented here.


def basic_block_forward(x_nchw, params):
    """x_nchw: (N, Cin, H, W) f32.  Returns (N, Cmid, H, W) f32."""
    w1, g1, b1, w2, g2, b2, wsc = params
    N, Cin, H, W = x_nchw.shape
    Cmid = w1.shape[0]
    assert W & (W - 1) == 0, "width must be a power of two for the roll tree"
    WCin, WCmid, NH = W * Cin, W * Cmid, N * H

    # ---- glue: layout plumbing into the lane-dense (N*H, W*C) layout ----
    x_nhwc = jnp.transpose(x_nchw, (0, 2, 3, 1))                    # NHWC
    xp = jnp.pad(x_nhwc, ((0, 0), (1, 1), (0, 0), (0, 0)))          # height pad
    xp = xp.reshape(N, H + 2, WCin).astype(jnp.bfloat16)

    w1b = _band3x3(w1, W).astype(jnp.bfloat16)                      # (3,WCin,WCmid)
    w2b = _band3x3(w2, W).astype(jnp.bfloat16)                      # (3,WCmid,WCmid)
    wscb = _band1x1(wsc, W).astype(jnp.bfloat16)                    # (WCin,WCmid)

    # BN gamma/beta pre-tiled across the W groups of the lane axis (f32).
    g1t = jnp.tile(g1, W).reshape(1, WCmid)
    b1t = jnp.tile(b1, W).reshape(1, WCmid)
    g2t = jnp.tile(g2, W).reshape(1, WCmid)
    b2t = jnp.tile(b2, W).reshape(1, WCmid)

    args = (xp, w1b, g1t, b1t, w2b, g2t, b2t, wscb)
    in_specs = [pl.BlockSpec(a.shape, lambda i, nd=a.ndim: (0,) * nd)
                for a in args]

    kernel = functools.partial(_basic_block_kernel, cmid=Cmid)

    # TODO(synk): on v7x a "parallel" grid axis over N/H would engage the 2nd
    # TensorCore, but BN needs global batch statistics and this problem size
    # is tiny, so a single grid step is kept.
    out = pl.pallas_call(
        kernel,
        out_shape=jax.ShapeDtypeStruct((NH, WCmid), jnp.float32),
        grid_spec=pltpu.PrefetchScalarGridSpec(
            num_scalar_prefetch=0,
            grid=(1,),
            in_specs=in_specs,
            out_specs=pl.BlockSpec((NH, WCmid), lambda i: (0, 0)),
            scratch_shapes=[pltpu.VMEM((N, H + 2, WCmid), jnp.bfloat16)],
        ),
        compiler_params=pltpu.CompilerParams(
            dimension_semantics=("arbitrary",)),
    )(*args)

    out = out.reshape(N, H, W, Cmid)                                # NHWC
    return jnp.transpose(out, (0, 3, 1, 2))                         # NCHW


def _reference(x_nchw, params):
    """Pure-JAX reference (matches PyTorch BasicBlock.forward, training BN)."""
    w1, g1, b1, w2, g2, b2, wsc = params

    def conv(x, w, pad):
        return jax.lax.conv_general_dilated(
            x, w, window_strides=(1, 1), padding=((pad, pad), (pad, pad)),
            dimension_numbers=('NCHW', 'OIHW', 'NCHW'),
            precision=jax.lax.Precision.HIGHEST)

    def bn(x, g, b):
        mean = jnp.mean(x, axis=(0, 2, 3), keepdims=True)
        var = jnp.mean((x - mean) ** 2, axis=(0, 2, 3), keepdims=True)
        return ((x - mean) / jnp.sqrt(var + EPS)) * g.reshape(1, -1, 1, 1) \
               + b.reshape(1, -1, 1, 1)

    h = jax.nn.relu(bn(conv(x_nchw, w1, 1), g1, b1))
    y = bn(conv(h, w2, 1), g2, b2)
    sc = conv(x_nchw, wsc, 0)
    return jax.nn.relu(y + sc)


if __name__ == "__main__":
    N, Cin, H, W = 2, 4, 16, 16
    Cmid = 8  # base_channels (!= Cin -> 1x1 shortcut active)

    key = jax.random.PRNGKey(0)
    k = jax.random.split(key, 8)
    w1 = 0.2 * jax.random.normal(k[0], (Cmid, Cin, 3, 3), jnp.float32)
    g1 = 1.0 + 0.1 * jax.random.normal(k[1], (Cmid,), jnp.float32)
    b1 = 0.1 * jax.random.normal(k[2], (Cmid,), jnp.float32)
    w2 = 0.2 * jax.random.normal(k[3], (Cmid, Cmid, 3, 3), jnp.float32)
    g2 = 1.0 + 0.1 * jax.random.normal(k[4], (Cmid,), jnp.float32)
    b2 = 0.1 * jax.random.normal(k[5], (Cmid,), jnp.float32)
    wsc = 0.2 * jax.random.normal(k[6], (Cmid, Cin, 1, 1), jnp.float32)
    x = jax.random.normal(k[7], (N, Cin, H, W), jnp.float32)

    params = (w1, g1, b1, w2, g2, b2, wsc)

    out = jax.block_until_ready(basic_block_forward(x, params))
    ref = jax.block_until_ready(_reference(x, params))

    assert out.shape == (N, Cmid, H, W), out.shape
    assert jnp.allclose(out, ref, rtol=2e-2, atol=2e-2), \
        float(jnp.max(jnp.abs(out - ref)))
    print("KERNEL_OK")
</pallas_src>

<mosaic_0001>
module attributes {stable_mosaic.version = 11 : i64} {
  func.func @_basic_block_kernel(%arg0: i32, %arg1: memref<2x18x64xbf16, #tpu.memory_space<vmem>>, %arg2: memref<3x64x128xbf16, #tpu.memory_space<vmem>>, %arg3: memref<1x128xf32, #tpu.memory_space<vmem>>, %arg4: memref<1x128xf32, #tpu.memory_space<vmem>>, %arg5: memref<3x128x128xbf16, #tpu.memory_space<vmem>>, %arg6: memref<1x128xf32, #tpu.memory_space<vmem>>, %arg7: memref<1x128xf32, #tpu.memory_space<vmem>>, %arg8: memref<64x128xbf16, #tpu.memory_space<vmem>>, %arg9: memref<32x128xf32, #tpu.memory_space<vmem>>, %arg10: memref<2x18x128xbf16, #tpu.memory_space<vmem>>) attributes {dimension_semantics = [#tpu.dimension_semantics<arbitrary>], iteration_bounds = array<i64: 1>, scalar_prefetch = 0 : i64, scratch_operands = 1 : i64, tpu.core_type = #tpu.core_type<tc>, window_params = [{pipeline_mode = #tpu.pipeline_mode<synchronous>, transform_indices = @transform_0, window_bounds = array<i64: 2, 18, 64>}, {pipeline_mode = #tpu.pipeline_mode<synchronous>, transform_indices = @transform_1, window_bounds = array<i64: 3, 64, 128>}, {pipeline_mode = #tpu.pipeline_mode<synchronous>, transform_indices = @transform_2, window_bounds = array<i64: 1, 128>}, {pipeline_mode = #tpu.pipeline_mode<synchronous>, transform_indices = @transform_3, window_bounds = array<i64: 1, 128>}, {pipeline_mode = #tpu.pipeline_mode<synchronous>, transform_indices = @transform_4, window_bounds = array<i64: 3, 128, 128>}, {pipeline_mode = #tpu.pipeline_mode<synchronous>, transform_indices = @transform_5, window_bounds = array<i64: 1, 128>}, {pipeline_mode = #tpu.pipeline_mode<synchronous>, transform_indices = @transform_6, window_bounds = array<i64: 1, 128>}, {pipeline_mode = #tpu.pipeline_mode<synchronous>, transform_indices = @transform_7, window_bounds = array<i64: 64, 128>}, {pipeline_mode = #tpu.pipeline_mode<synchronous>, transform_indices = @transform_8, window_bounds = array<i64: 32, 128>}]} {
    %cst = arith.constant 0.000000e+00 : f32
    %0 = vector.broadcast %cst : f32 to vector<32x128xf32>
    %c0 = arith.constant 0 : index
    %c0_0 = arith.constant 0 : index
    %c0_1 = arith.constant 0 : index
    %1 = vector.load %arg1[%c0, %c0_0, %c0_1] : memref<2x18x64xbf16, #tpu.memory_space<vmem>>, vector<2x16x64xbf16>
    %2 = vector.shape_cast %1 : vector<2x16x64xbf16> to vector<32x64xbf16>
    %c0_2 = arith.constant 0 : index
    %c0_3 = arith.constant 0 : index
    %c0_4 = arith.constant 0 : index
    %3 = vector.load %arg2[%c0_2, %c0_3, %c0_4] : memref<3x64x128xbf16, #tpu.memory_space<vmem>>, vector<1x64x128xbf16>
    %4 = vector.shape_cast %3 : vector<1x64x128xbf16> to vector<64x128xbf16>
    %cst_5 = arith.constant dense<0.000000e+00> : vector<32x128xf32>
    %5 = tpu.matmul %2, %4, %cst_5 {dimension_numbers = #tpu.dot_dimension_numbers<[1], [0], [0], [1], [0, 0, 1, 1], [], []>} : vector<32x64xbf16>, vector<64x128xbf16>, vector<32x128xf32> -> vector<32x128xf32>
    %6 = arith.addf %0, %5 : vector<32x128xf32>
    %c0_6 = arith.constant 0 : index
    %c1 = arith.constant 1 : index
    %c0_7 = arith.constant 0 : index
    %7 = vector.load %arg1[%c0_6, %c1, %c0_7] : memref<2x18x64xbf16, #tpu.memory_space<vmem>>, vector<2x16x64xbf16>
    %8 = vector.shape_cast %7 : vector<2x16x64xbf16> to vector<32x64xbf16>
    %c1_8 = arith.constant 1 : index
    %c0_9 = arith.constant 0 : index
    %c0_10 = arith.constant 0 : index
    %9 = vector.load %arg2[%c1_8, %c0_9, %c0_10] : memref<3x64x128xbf16, #tpu.memory_space<vmem>>, vector<1x64x128xbf16>
    %10 = vector.shape_cast %9 : vector<1x64x128xbf16> to vector<64x128xbf16>
    %cst_11 = arith.constant dense<0.000000e+00> : vector<32x128xf32>
    %11 = tpu.matmul %8, %10, %cst_11 {dimension_numbers = #tpu.dot_dimension_numbers<[1], [0], [0], [1], [0, 0, 1, 1], [], []>} : vector<32x64xbf16>, vector<64x128xbf16>, vector<32x128xf32> -> vector<32x128xf32>
    %12 = arith.addf %6, %11 : vector<32x128xf32>
    %c0_12 = arith.constant 0 : index
    %c2 = arith.constant 2 : index
    %c0_13 = arith.constant 0 : index
    %13 = vector.load %arg1[%c0_12, %c2, %c0_13] : memref<2x18x64xbf16, #tpu.memory_space<vmem>>, vector<2x16x64xbf16>
    %14 = vector.shape_cast %13 : vector<2x16x64xbf16> to vector<32x64xbf16>
    %c2_14 = arith.constant 2 : index
    %c0_15 = arith.constant 0 : index
    %c0_16 = arith.constant 0 : index
    %15 = vector.load %arg2[%c2_14, %c0_15, %c0_16] : memref<3x64x128xbf16, #tpu.memory_space<vmem>>, vector<1x64x128xbf16>
    %16 = vector.shape_cast %15 : vector<1x64x128xbf16> to vector<64x128xbf16>
    %cst_17 = arith.constant dense<0.000000e+00> : vector<32x128xf32>
    %17 = tpu.matmul %14, %16, %cst_17 {dimension_numbers = #tpu.dot_dimension_numbers<[1], [0], [0], [1], [0, 0, 1, 1], [], []>} : vector<32x64xbf16>, vector<64x128xbf16>, vector<32x128xf32> -> vector<32x128xf32>
    %18 = arith.addf %12, %17 : vector<32x128xf32>
    %cst_18 = arith.constant dense<0.000000e+00> : vector<128xf32>
    %19 = vector.multi_reduction <add>, %18, %cst_18 [0] : vector<32x128xf32> to vector<128xf32>
    %20 = vector.shape_cast %19 : vector<128xf32> to vector<1x128xf32>
    %c8_i32 = arith.constant 8 : i32
    %21 = tpu.dynamic_rotate %20 by %c8_i32 dim 1 : vector<1x128xf32>, i32 -> vector<1x128xf32>
    %22 = arith.addf %20, %21 : vector<1x128xf32>
    %c16_i32 = arith.constant 16 : i32
    %23 = tpu.dynamic_rotate %22 by %c16_i32 dim 1 : vector<1x128xf32>, i32 -> vector<1x128xf32>
    %24 = arith.addf %22, %23 : vector<1x128xf32>
    %c32_i32 = arith.constant 32 : i32
    %25 = tpu.dynamic_rotate %24 by %c32_i32 dim 1 : vector<1x128xf32>, i32 -> vector<1x128xf32>
    %26 = arith.addf %24, %25 : vector<1x128xf32>
    %c64_i32 = arith.constant 64 : i32
    %27 = tpu.dynamic_rotate %26 by %c64_i32 dim 1 : vector<1x128xf32>, i32 -> vector<1x128xf32>
    %28 = arith.addf %26, %27 : vector<1x128xf32>
    %29 = arith.mulf %18, %18 : vector<32x128xf32>
    %cst_19 = arith.constant dense<0.000000e+00> : vector<128xf32>
    %30 = vector.multi_reduction <add>, %29, %cst_19 [0] : vector<32x128xf32> to vector<128xf32>
    %31 = vector.shape_cast %30 : vector<128xf32> to vector<1x128xf32>
    %c8_i32_20 = arith.constant 8 : i32
    %32 = tpu.dynamic_rotate %31 by %c8_i32_20 dim 1 : vector<1x128xf32>, i32 -> vector<1x128xf32>
    %33 = arith.addf %31, %32 : vector<1x128xf32>
    %c16_i32_21 = arith.constant 16 : i32
    %34 = tpu.dynamic_rotate %33 by %c16_i32_21 dim 1 : vector<1x128xf32>, i32 -> vector<1x128xf32>
    %35 = arith.addf %33, %34 : vector<1x128xf32>
    %c32_i32_22 = arith.constant 32 : i32
    %36 = tpu.dynamic_rotate %35 by %c32_i32_22 dim 1 : vector<1x128xf32>, i32 -> vector<1x128xf32>
    %37 = arith.addf %35, %36 : vector<1x128xf32>
    %c64_i32_23 = arith.constant 64 : i32
    %38 = tpu.dynamic_rotate %37 by %c64_i32_23 dim 1 : vector<1x128xf32>, i32 -> vector<1x128xf32>
    %39 = arith.addf %37, %38 : vector<1x128xf32>
    %cst_24 = arith.constant 0.001953125 : f32
    %40 = vector.broadcast %cst_24 : f32 to vector<1x128xf32>
    %41 = arith.mulf %28, %40 : vector<1x128xf32>
    %cst_25 = arith.constant 0.001953125 : f32
    %42 = vector.broadcast %cst_25 : f32 to vector<1x128xf32>
    %43 = arith.mulf %39, %42 : vector<1x128xf32>
    %44 = arith.mulf %41, %41 : vector<1x128xf32>
    %45 = arith.subf %43, %44 : vector<1x128xf32>
    %c0_26 = arith.constant 0 : index
    %c0_27 = arith.constant 0 : index
    %46 = vector.load %arg3[%c0_26, %c0_27] : memref<1x128xf32, #tpu.memory_space<vmem>>, vector<1x128xf32>
    %cst_28 = arith.constant 9.99999974E-6 : f32
    %47 = vector.broadcast %cst_28 : f32 to vector<1x128xf32>
    %48 = arith.addf %45, %47 : vector<1x128xf32>
    %49 = math.rsqrt %48 : vector<1x128xf32>
    %50 = arith.mulf %46, %49 : vector<1x128xf32>
    %c0_29 = arith.constant 0 : index
    %c0_30 = arith.constant 0 : index
    %51 = vector.load %arg4[%c0_29, %c0_30] : memref<1x128xf32, #tpu.memory_space<vmem>>, vector<1x128xf32>
    %52 = arith.mulf %41, %50 : vector<1x128xf32>
    %53 = arith.subf %51, %52 : vector<1x128xf32>
    %54 = vector.broadcast %50 : vector<1x128xf32> to vector<32x128xf32>
    %55 = arith.mulf %18, %54 : vector<32x128xf32>
    %56 = vector.broadcast %53 : vector<1x128xf32> to vector<32x128xf32>
    %57 = arith.addf %55, %56 : vector<32x128xf32>
    %cst_31 = arith.constant 0.000000e+00 : f32
    %58 = vector.broadcast %cst_31 : f32 to vector<32x128xf32>
    %59 = arith.maximumf %57, %58 : vector<32x128xf32>
    %cst_32 = arith.constant 0.000000e+00 : bf16
    %60 = vector.broadcast %cst_32 : bf16 to vector<2x1x128xbf16>
    %c0_33 = arith.constant 0 : index
    %c0_34 = arith.constant 0 : index
    %c0_35 = arith.constant 0 : index
    %61 = vector.load %arg10[%c0_33, %c0_34, %c0_35] : memref<2x18x128xbf16, #tpu.memory_space<vmem>>, vector<2x1x128xbf16>
    tpu.vector_store %arg10[%c0_33, %c0_34, %c0_35], %60 {strides = array<i32>} : memref<2x18x128xbf16, #tpu.memory_space<vmem>>, vector<2x1x128xbf16>,
    %cst_36 = arith.constant 0.000000e+00 : bf16
    %62 = vector.broadcast %cst_36 : bf16 to vector<2x1x128xbf16>
    %c0_37 = arith.constant 0 : index
    %c17 = arith.constant 17 : index
    %c0_38 = arith.constant 0 : index
    %63 = vector.load %arg10[%c0_37, %c17, %c0_38] : memref<2x18x128xbf16, #tpu.memory_space<vmem>>, vector<2x1x128xbf16>
    tpu.vector_store %arg10[%c0_37, %c17, %c0_38], %62 {strides = array<i32>} : memref<2x18x128xbf16, #tpu.memory_space<vmem>>, vector<2x1x128xbf16>,
    %64 = arith.truncf %59 : vector<32x128xf32> to vector<32x128xbf16>
    %65 = vector.shape_cast %64 : vector<32x128xbf16> to vector<2x16x128xbf16>
    %c0_39 = arith.constant 0 : index
    %c1_40 = arith.constant 1 : index
    %c0_41 = arith.constant 0 : index
    %66 = vector.load %arg10[%c0_39, %c1_40, %c0_41] : memref<2x18x128xbf16, #tpu.memory_space<vmem>>, vector<2x16x128xbf16>
    tpu.vector_store %arg10[%c0_39, %c1_40, %c0_41], %65 {strides = array<i32>} : memref<2x18x128xbf16, #tpu.memory_space<vmem>>, vector<2x16x128xbf16>,
    %cst_42 = arith.constant 0.000000e+00 : f32
    %67 = vector.broadcast %cst_42 : f32 to vector<32x128xf32>
    %c0_43 = arith.constant 0 : index
    %c0_44 = arith.constant 0 : index
    %c0_45 = arith.constant 0 : index
    %68 = vector.load %arg10[%c0_43, %c0_44, %c0_45] : memref<2x18x128xbf16, #tpu.memory_space<vmem>>, vector<2x16x128xbf16>
    %69 = vector.shape_cast %68 : vector<2x16x128xbf16> to vector<32x128xbf16>
    %c0_46 = arith.constant 0 : index
    %c0_47 = arith.constant 0 : index
    %c0_48 = arith.constant 0 : index
    %70 = vector.load %arg5[%c0_46, %c0_47, %c0_48] : memref<3x128x128xbf16, #tpu.memory_space<vmem>>, vector<1x128x128xbf16>
    %71 = vector.shape_cast %70 : vector<1x128x128xbf16> to vector<128x128xbf16>
    %cst_49 = arith.constant dense<0.000000e+00> : vector<32x128xf32>
    %72 = tpu.matmul %69, %71, %cst_49 {dimension_numbers = #tpu.dot_dimension_numbers<[1], [0], [0], [1], [0, 0, 1, 1], [], []>} : vector<32x128xbf16>, vector<128x128xbf16>, vector<32x128xf32> -> vector<32x128xf32>
    %73 = arith.addf %67, %72 : vector<32x128xf32>
    %c0_50 = arith.constant 0 : index
    %c1_51 = arith.constant 1 : index
    %c0_52 = arith.constant 0 : index
    %74 = vector.load %arg10[%c0_50, %c1_51, %c0_52] : memref<2x18x128xbf16, #tpu.memory_space<vmem>>, vector<2x16x128xbf16>
    %75 = vector.shape_cast %74 : vector<2x16x128xbf16> to vector<32x128xbf16>
    %c1_53 = arith.constant 1 : index
    %c0_54 = arith.constant 0 : index
    %c0_55 = arith.constant 0 : index
    %76 = vector.load %arg5[%c1_53, %c0_54, %c0_55] : memref<3x128x128xbf16, #tpu.memory_space<vmem>>, vector<1x128x128xbf16>
    %77 = vector.shape_cast %76 : vector<1x128x128xbf16> to vector<128x128xbf16>
    %cst_56 = arith.constant dense<0.000000e+00> : vector<32x128xf32>
    %78 = tpu.matmul %75, %77, %cst_56 {dimension_numbers = #tpu.dot_dimension_numbers<[1], [0], [0], [1], [0, 0, 1, 1], [], []>} : vector<32x128xbf16>, vector<128x128xbf16>, vector<32x128xf32> -> vector<32x128xf32>
    %79 = arith.addf %73, %78 : vector<32x128xf32>
    %c0_57 = arith.constant 0 : index
    %c2_58 = arith.constant 2 : index
    %c0_59 = arith.constant 0 : index
    %80 = vector.load %arg10[%c0_57, %c2_58, %c0_59] : memref<2x18x128xbf16, #tpu.memory_space<vmem>>, vector<2x16x128xbf16>
    %81 = vector.shape_cast %80 : vector<2x16x128xbf16> to vector<32x128xbf16>
    %c2_60 = arith.constant 2 : index
    %c0_61 = arith.constant 0 : index
    %c0_62 = arith.constant 0 : index
    %82 = vector.load %arg5[%c2_60, %c0_61, %c0_62] : memref<3x128x128xbf16, #tpu.memory_space<vmem>>, vector<1x128x128xbf16>
    %83 = vector.shape_cast %82 : vector<1x128x128xbf16> to vector<128x128xbf16>
    %cst_63 = arith.constant dense<0.000000e+00> : vector<32x128xf32>
    %84 = tpu.matmul %81, %83, %cst_63 {dimension_numbers = #tpu.dot_dimension_numbers<[1], [0], [0], [1], [0, 0, 1, 1], [], []>} : vector<32x128xbf16>, vector<128x128xbf16>, vector<32x128xf32> -> vector<32x128xf32>
    %85 = arith.addf %79, %84 : vector<32x128xf32>
    %cst_64 = arith.constant dense<0.000000e+00> : vector<128xf32>
    %86 = vector.multi_reduction <add>, %85, %cst_64 [0] : vector<32x128xf32> to vector<128xf32>
    %87 = vector.shape_cast %86 : vector<128xf32> to vector<1x128xf32>
    %c8_i32_65 = arith.constant 8 : i32
    %88 = tpu.dynamic_rotate %87 by %c8_i32_65 dim 1 : vector<1x128xf32>, i32 -> vector<1x128xf32>
    %89 = arith.addf %87, %88 : vector<1x128xf32>
    %c16_i32_66 = arith.constant 16 : i32
    %90 = tpu.dynamic_rotate %89 by %c16_i32_66 dim 1 : vector<1x128xf32>, i32 -> vector<1x128xf32>
    %91 = arith.addf %89, %90 : vector<1x128xf32>
    %c32_i32_67 = arith.constant 32 : i32
    %92 = tpu.dynamic_rotate %91 by %c32_i32_67 dim 1 : vector<1x128xf32>, i32 -> vector<1x128xf32>
    %93 = arith.addf %91, %92 : vector<1x128xf32>
    %c64_i32_68 = arith.constant 64 : i32
    %94 = tpu.dynamic_rotate %93 by %c64_i32_68 dim 1 : vector<1x128xf32>, i32 -> vector<1x128xf32>
    %95 = arith.addf %93, %94 : vector<1x128xf32>
    %96 = arith.mulf %85, %85 : vector<32x128xf32>
    %cst_69 = arith.constant dense<0.000000e+00> : vector<128xf32>
    %97 = vector.multi_reduction <add>, %96, %cst_69 [0] : vector<32x128xf32> to vector<128xf32>
    %98 = vector.shape_cast %97 : vector<128xf32> to vector<1x128xf32>
    %c8_i32_70 = arith.constant 8 : i32
    %99 = tpu.dynamic_rotate %98 by %c8_i32_70 dim 1 : vector<1x128xf32>, i32 -> vector<1x128xf32>
    %100 = arith.addf %98, %99 : vector<1x128xf32>
    %c16_i32_71 = arith.constant 16 : i32
    %101 = tpu.dynamic_rotate %100 by %c16_i32_71 dim 1 : vector<1x128xf32>, i32 -> vector<1x128xf32>
    %102 = arith.addf %100, %101 : vector<1x128xf32>
    %c32_i32_72 = arith.constant 32 : i32
    %103 = tpu.dynamic_rotate %102 by %c32_i32_72 dim 1 : vector<1x128xf32>, i32 -> vector<1x128xf32>
    %104 = arith.addf %102, %103 : vector<1x128xf32>
    %c64_i32_73 = arith.constant 64 : i32
    %105 = tpu.dynamic_rotate %104 by %c64_i32_73 dim 1 : vector<1x128xf32>, i32 -> vector<1x128xf32>
    %106 = arith.addf %104, %105 : vector<1x128xf32>
    %cst_74 = arith.constant 0.001953125 : f32
    %107 = vector.broadcast %cst_74 : f32 to vector<1x128xf32>
    %108 = arith.mulf %95, %107 : vector<1x128xf32>
    %cst_75 = arith.constant 0.001953125 : f32
    %109 = vector.broadcast %cst_75 : f32 to vector<1x128xf32>
    %110 = arith.mulf %106, %109 : vector<1x128xf32>
    %111 = arith.mulf %108, %108 : vector<1x128xf32>
    %112 = arith.subf %110, %111 : vector<1x128xf32>
    %c0_76 = arith.constant 0 : index
    %c0_77 = arith.constant 0 : index
    %113 = vector.load %arg6[%c0_76, %c0_77] : memref<1x128xf32, #tpu.memory_space<vmem>>, vector<1x128xf32>
    %cst_78 = arith.constant 9.99999974E-6 : f32
    %114 = vector.broadcast %cst_78 : f32 to vector<1x128xf32>
    %115 = arith.addf %112, %114 : vector<1x128xf32>
    %116 = math.rsqrt %115 : vector<1x128xf32>
    %117 = arith.mulf %113, %116 : vector<1x128xf32>
    %c0_79 = arith.constant 0 : index
    %c0_80 = arith.constant 0 : index
    %118 = vector.load %arg7[%c0_79, %c0_80] : memref<1x128xf32, #tpu.memory_space<vmem>>, vector<1x128xf32>
    %119 = arith.mulf %108, %117 : vector<1x128xf32>
    %120 = arith.subf %118, %119 : vector<1x128xf32>
    %121 = vector.broadcast %117 : vector<1x128xf32> to vector<32x128xf32>
    %122 = arith.mulf %85, %121 : vector<32x128xf32>
    %123 = vector.broadcast %120 : vector<1x128xf32> to vector<32x128xf32>
    %124 = arith.addf %122, %123 : vector<32x128xf32>
    %c0_81 = arith.constant 0 : index
    %c1_82 = arith.constant 1 : index
    %c0_83 = arith.constant 0 : index
    %125 = vector.load %arg1[%c0_81, %c1_82, %c0_83] : memref<2x18x64xbf16, #tpu.memory_space<vmem>>, vector<2x16x64xbf16>
    %126 = vector.shape_cast %125 : vector<2x16x64xbf16> to vector<32x64xbf16>
    %c0_84 = arith.constant 0 : index
    %c0_85 = arith.constant 0 : index
    %127 = vector.load %arg8[%c0_84, %c0_85] : memref<64x128xbf16, #tpu.memory_space<vmem>>, vector<64x128xbf16>
    %cst_86 = arith.constant dense<0.000000e+00> : vector<32x128xf32>
    %128 = tpu.matmul %126, %127, %cst_86 {dimension_numbers = #tpu.dot_dimension_numbers<[1], [0], [0], [1], [0, 0, 1, 1], [], []>} : vector<32x64xbf16>, vector<64x128xbf16>, vector<32x128xf32> -> vector<32x128xf32>
    %129 = arith.addf %124, %128 : vector<32x128xf32>
    %cst_87 = arith.constant 0.000000e+00 : f32
    %130 = vector.broadcast %cst_87 : f32 to vector<32x128xf32>
    %131 = arith.maximumf %129, %130 : vector<32x128xf32>
    %c0_88 = arith.constant 0 : index
    %c0_89 = arith.constant 0 : index
    %132 = vector.load %arg9[%c0_88, %c0_89] : memref<32x128xf32, #tpu.memory_space<vmem>>, vector<32x128xf32>
    tpu.vector_store %arg9[%c0_88, %c0_89], %131 {strides = array<i32>} : memref<32x128xf32, #tpu.memory_space<vmem>>, vector<32x128xf32>,
    return
  }
  func.func @transform_0(%arg0: i32) -> (i32, i32, i32) {
    %c0_i32 = arith.constant 0 : i32
    %c0_i32_0 = arith.constant 0 : i32
    %c0_i32_1 = arith.constant 0 : i32
    %c0_i32_2 = arith.constant 0 : i32
    return %c0_i32, %c0_i32_0, %c0_i32_1 : i32, i32, i32
  }
  func.func @transform_1(%arg0: i32) -> (i32, i32, i32) {
    %c0_i32 = arith.constant 0 : i32
    %c0_i32_0 = arith.constant 0 : i32
    %c0_i32_1 = arith.constant 0 : i32
    %c0_i32_2 = arith.constant 0 : i32
    return %c0_i32, %c0_i32_0, %c0_i32_1 : i32, i32, i32
  }
  func.func @transform_2(%arg0: i32) -> (i32, i32) {
    %c0_i32 = arith.constant 0 : i32
    %c0_i32_0 = arith.constant 0 : i32
    %c0_i32_1 = arith.constant 0 : i32
    return %c0_i32, %c0_i32_0 : i32, i32
  }
  func.func @transform_3(%arg0: i32) -> (i32, i32) {
    %c0_i32 = arith.constant 0 : i32
    %c0_i32_0 = arith.constant 0 : i32
    %c0_i32_1 = arith.constant 0 : i32
    return %c0_i32, %c0_i32_0 : i32, i32
  }
  func.func @transform_4(%arg0: i32) -> (i32, i32, i32) {
    %c0_i32 = arith.constant 0 : i32
    %c0_i32_0 = arith.constant 0 : i32
    %c0_i32_1 = arith.constant 0 : i32
    %c0_i32_2 = arith.constant 0 : i32
    return %c0_i32, %c0_i32_0, %c0_i32_1 : i32, i32, i32
  }
  func.func @transform_5(%arg0: i32) -> (i32, i32) {
    %c0_i32 = arith.constant 0 : i32
    %c0_i32_0 = arith.constant 0 : i32
    %c0_i32_1 = arith.constant 0 : i32
    return %c0_i32, %c0_i32_0 : i32, i32
  }
  func.func @transform_6(%arg0: i32) -> (i32, i32) {
    %c0_i32 = arith.constant 0 : i32
    %c0_i32_0 = arith.constant 0 : i32
    %c0_i32_1 = arith.constant 0 : i32
    return %c0_i32, %c0_i32_0 : i32, i32
  }
  func.func @transform_7(%arg0: i32) -> (i32, i32) {
    %c0_i32 = arith.constant 0 : i32
    %c0_i32_0 = arith.constant 0 : i32
    %c0_i32_1 = arith.constant 0 : i32
    return %c0_i32, %c0_i32_0 : i32, i32
  }
  func.func @transform_8(%arg0: i32) -> (i32, i32) {
    %c0_i32 = arith.constant 0 : i32
    %c0_i32_0 = arith.constant 0 : i32
    %c0_i32_1 = arith.constant 0 : i32
    return %c0_i32, %c0_i32_0 : i32, i32
  }
}

</mosaic_0001>

<bundles_post_ra>
// kernel: tpu_custom_call.1
= control target key start
LH: loop header
LB: loop body
LE: loop exit
PB: predicated region body
PF: predicated region fallthrough
CT: control target
= control target key end

     0   :  { %13 = vsyncpa [#allocation4], 0  ;;  %s2055_s0 = inlined_call_operand.vmem [shape: bf16[2,18,64], index: 0, kind: input, shape index: {}]   ;;  %s2056_s1 = inlined_call_operand.hbm [shape: bf16[3,64,128], index: 1, kind: input, shape index: {}]   ;;  %s2057_s2 = inlined_call_operand.vmem [shape: f32[1,128], index: 2, kind: input, shape index: {}]   ;;  %s2058_s3 = inlined_call_operand.vmem [shape: f32[1,128], index: 3, kind: input, shape index: {}]   ;;  %s2059_s4 = inlined_call_operand.hbm [shape: bf16[3,128,128], index: 4, kind: input, shape index: {}]   ;;  %s2060_s5 = inlined_call_operand.vmem [shape: f32[1,128], index: 5, kind: input, shape index: {}]   ;;  %s2061_s6 = inlined_call_operand.vmem [shape: f32[1,128], index: 6, kind: input, shape index: {}]   ;;  %s2062_s7 = inlined_call_operand.vmem [shape: bf16[64,128], index: 7, kind: input, shape index: {}]   ;;  %s2063_s8 = inlined_call_operand.hbm [shape: f32[32,128], index: 8, kind: output, shape index: {}]  }
   0x1   :  { %14 = vsyncpa [#allocation7], 0 }
   0x2   :  { %15 = vsyncpa [#allocation5], 0  ;;  %s1679_s27 = smov [#allocation3]   ;;  %s1607_s9 = scalar_lea.hbm %s2056_s1, 1536 }
   0x3   :  { %s23_s28 = sshll.u32 %s1679_s27, 4  ;;  %p1608_p0 = scmp.ne.s32.totalorder %s2056_s1, %s1607_s9  ;;  %s24_s28 = int_to_ptr.vmem [resolvable:$true] %s23_s28 }
   0x4   :  { %p1611_p1 = scmp.lt.u32.totalorder %s1607_s9, %s2056_s1 }
   0x6   :  { %p1613_p2 = pnand %p1611_p1, %p1608_p0 }
   0x8   :  { %1616 = shalt.err (!%p1613_p2)
}
   0x9   :  { %s1617_s14 = scalar_lea.vmem %s24_s28, 1536  ;;  %p1622_p4 = scmp.lt.s32.totalorder %s24_s28, %s24_s28 }
   0xa   :  { %p1618_p3 = scmp.ne.s32.totalorder %s24_s28, %s1617_s14  ;;  %p1623_p5 = scmp.lt.s32.totalorder %s1617_s14, %s1617_s14 }
   0xc   :  { %p1624_p6 = por %p1623_p5, %p1622_p4 }
   0xe   :  { %p1625_p7 = pnand %p1624_p6, %p1618_p3 }
  0x10   :  { %1628 = shalt.err (!%p1625_p7)
}
  0x11   :  { %s1680_s15 = smov 64   ;;  %s1681_s16 = smov 4  }
  0x12   :  { %29 = dma.hbm_to_vmem [thread:$0]  %s2056_s1, 1536, %s24_s28, [#allocation4], %s1680_s15, %s1680_s15, %s1681_s16  }
  0x13   :  { %s1682_s19 = smov [#allocation6]   ;;  %s1629_s23 = scalar_lea.hbm %s2059_s4, 3072 }
  0x14   :  { %s39_s20 = sshll.u32 %s1682_s19, 4  ;;  %p1630_p8 = scmp.ne.s32.totalorder %s2059_s4, %s1629_s23  ;;  %s40_s20 = int_to_ptr.vmem [resolvable:$true] %s39_s20 }
  0x15   :  { %p1633_p9 = scmp.lt.u32.totalorder %s1629_s23, %s2059_s4 }
  0x17   :  { %p1635_p10 = pnand %p1633_p9, %p1630_p8 }
  0x19   :  { %1638 = shalt.err (!%p1635_p10)
}
  0x1a   :  { %s1639_s29 = scalar_lea.vmem %s40_s20, 3072  ;;  %p1644_p12 = scmp.lt.s32.totalorder %s40_s20, %s40_s20 }
  0x1b   :  { %p1640_p11 = scmp.ne.s32.totalorder %s40_s20, %s1639_s29  ;;  %p1645_p13 = scmp.lt.s32.totalorder %s1639_s29, %s1639_s29 }
  0x1d   :  { %p1646_p0 = por %p1645_p13, %p1644_p12 }
  0x1f   :  { %p1647_p1 = pnand %p1646_p0, %p1640_p11 }
  0x21   :  { %1650 = shalt.err (!%p1647_p1)
}
  0x22   :  { %45 = dma.hbm_to_vmem [thread:$0]  %s2059_s4, 3072, %s40_s20, [#allocation7], %s1680_s15, %s1680_s15, %s1681_s16  }
  0x23   :  { %1673 = dma.done.wait [#allocation4], 1536  }
  0x24   :  { %1674 = vsyncadd [#allocation4], 4294965760 }
  0x25   :  { %1675 = dma.done.wait [#allocation7], 3072  }
  0x26   :  { %1676 = vsyncadd [#allocation7], 4294964224  ;;  %v1559_v0 = vld [vmem:[#allocation3 + $0x20] sm:$0xff]   ;;  %v1560_v1 = vld [vmem:[#allocation3 + $0x28] sm:$0xff]   ;;  %vm73_vm0 = vsmask.f32 3328 }
  0x27   :  { %1426 = vmatprep.subr.bf16.mxu0 %v1559_v0  ;;  %v1561_v2 = vld [vmem:[#allocation3 + $0x30] sm:$0xff]   ;;  %v1764_v3 = vld [vmem:[%s2055_s0] sm:$0xf]  ;;  %v1769_v4 = vld [vmem:[%s2055_s0 + $0x4] sm:$0xf]  ;;  %vm163_vm3 = vcmask 523264  }
  0x28   :  { %1427 = vmatpush3.bf16.msra.mxu0 %v1559_v0  ;;  %v1774_v5 = vld [vmem:[%s2055_s0 + $0x8] sm:$0x1]  ;;  %v77_v6 = vshrl.u32 %v1764_v3, 16  ;;  %v80_v7 = vshll.u32 %v1764_v3, 16  ;;  %v86_v8 = vshll.u32 %v1769_v4, 16  ;;  %v90_v9 = vshrl.u32 %v1769_v4, 16 }
  0x29   :  { %1428 = vmatprep.subr.bf16.mxu0 %v1560_v1  ;;  %v1562_v10 = vld [vmem:[#allocation3 + $0x38] sm:$0xff]   ;;  %vm74_vm1 = vsmask.f32 7440  ;;  %v96_v11 = vshll.u32 %v1774_v5, 16  ;;  %v1784_v16 = vld [vmem:[%s2055_s0 + $0xc] sm:$0xf]  ;;  %v1306_v49 = vcombine.low %v1764_v3, %v1769_v4 }
  0x2a   :  { %v79_v12 = vrot.slane %v77_v6, 4  ;;  %v82_v13 = vrot.slane %v80_v7, 5  ;;  %v88_v14 = vrot.slane %v86_v8, 5  ;;  %v92_v15 = vrot.slane %v90_v9, 4  ;;  %v1789_v18 = vld [vmem:[%s2055_s0 + $0x10] sm:$0xf]  ;;  %vm1801_vm2 = vmor %vm73_vm0, %vm74_vm1 }
  0x2b   :  { %v98_v17 = vrot.slane %v96_v11, 5  ;;  %v1794_v19 = vld [vmem:[%s2055_s0 + $0x14] sm:$0x1]  ;;  %v101_v20 = vshrl.u32 %v1784_v16, 16  ;;  %v104_v23 = vshll.u32 %v1784_v16, 16  ;;  %v110_v24 = vshll.u32 %v1789_v18, 16 }
  0x2c   :  { %1429 = vmatpush3.bf16.msra.mxu0 %v1560_v1  ;;  %v83_v21 = vor.u32 %v82_v13, %v79_v12  ;;  %v93_v22 = vor.u32 %v92_v15, %v88_v14  ;;  %v114_v27 = vshrl.u32 %v1789_v18, 16  ;;  %v120_v28 = vshll.u32 %v1794_v19, 16  ;;  %v1563_v33 = vld [vmem:[#allocation3] sm:$0xff]   ;;  %v308_v45 = vld [vmem:[%s2055_s0] sm:$0xe]  ;;  %v1565_v54 = vld [vmem:[#allocation3 + $0x10] sm:$0xff]  }
  0x2d   :  { %1430 = vmatprep.subr.bf16.mxu0 %v1561_v2  ;;  %v103_v26 = vrot.slane %v101_v20, 4  ;;  %v106_v31 = vrot.slane %v104_v23, 5  ;;  %v112_v32 = vrot.slane %v110_v24, 5  ;;  %v319_v43 = vrot.slane %v1769_v4, 5  ;;  %v1564_v48 = vld [vmem:[#allocation3 + $0x8] sm:$0xff]   ;;  %v1566_v55 = vld [vmem:[#allocation3 + $0x18] sm:$0xff]  }
  0x2e   :  { %v84_v29 = vrot.slane %v83_v21, 4  ;;  %v94_v30 = vrot.slane %v93_v22, 4  ;;  %v116_v34 = vrot.slane %v114_v27, 4  ;;  %v122_v40 = vrot.slane %v120_v28, 5  ;;  %v1568_v56 = vld [vmem:[#allocation3 + $0x40] sm:$0xff]   ;;  %v1570_v60 = vld [vmem:[#allocation3 + $0x48] sm:$0xff]  }
  0x2f   :  { %v107_v37 = vor.u32 %v106_v31, %v103_v26  ;;  %vm314_vm4 = vcmask 1042432   ;;  %vm315_vm5 = vcmask 1046532   ;;  %v322_v46 = vrot.slane %v1774_v5, 5  ;;  %v1571_v63 = vld [vmem:[#allocation3 + $0x50] sm:$0xff]   ;;  %v1572_v4 = vld [vmem:[#allocation3 + $0x58] sm:$0xff]   ;;  %s1683_s24 = smov 8  }
  0x30   :  { %1431 = vmatpush3.bf16.msra.mxu0 %v1561_v2  ;;  %v89_v35 = vsel %vm1801_vm2, %v84_v29, %v88_v14  ;;  %v99_v36 = vsel %vm1801_vm2, %v94_v30, %v98_v17  ;;  %v117_v39 = vor.u32 %v116_v34, %v112_v32  ;;  %vm1823_vm6 = vmor %vm314_vm4, %vm315_vm5  ;;  %v1314_v52 = vrot.slane %v308_v45, 9  ;;  %v309_v0 = vld [vmem:[%s2055_s0 + $0xc] sm:$0xe]  ;;  %s1684_s25 = smov 16   ;;  %s1685_s26 = smov 32  }
  0x31   :  { %1432 = vmatprep.subr.bf16.mxu0 %v1562_v10  ;;  %v1298_v38 = vcombine.low %v89_v35, %v99_v36  ;;  %v108_v41 = vrot.slane %v107_v37, 4  ;;  %v321_v53 = vrot.slane %v319_v43, 4  ;;  %v1307_v59 = vcombine.low %v1784_v16, %v1789_v18  ;;  %v1597_v51 = vld [vmem:[#allocation6 + $0xb0] sm:$0xff]  }
  0x32   :  { %v118_v42 = vrot.slane %v117_v39, 4  ;;  %v320_v57 = vsel %vm1823_vm6, %v1314_v52, %v319_v43  ;;  %v326_v62 = vrot.slane %v1789_v18, 5  ;;  %v329_v1 = vrot.slane %v1794_v19, 5  ;;  %v513_v43 = vld [vmem:[#allocation2] sm:$0x1] }
  0x33   :  { %1434 = vmatprep.mubr.msk.bf16.mxu0 %vm163_vm3, %v1298_v38  ;;  %v113_v44 = vsel %vm1801_vm2, %v108_v41, %v112_v32  ;;  %v323_v58 = vsel %vm1823_vm6, %v321_v53, %v322_v46  ;;  %v1315_v2 = vrot.slane %v309_v0, 9  ;;  %vm510_vm7 = vcmask 1040384   ;;  %v521_v46 = vld [vmem:[#allocation2 + $0x8] sm:$0x1]  ;;  %v1580_v0 = vld [vmem:[#allocation6 + $0x78] sm:$0xff]  }
  0x34   :  { %1433 = vmatpush3.bf16.msra.mxu0 %v1562_v10  ;;  %v123_v47 = vsel %vm1801_vm2, %v118_v42, %v122_v40  ;;  %v1316_v61 = vcombine.low %v320_v57, %v323_v58  ;;  %v328_v3 = vrot.slane %v326_v62, 4  ;;  %vm511_vm8 = vsmask.f32 256  ;;  %v1573_v57 = vld [vmem:[#allocation6 + $0x40] sm:$0xff]   ;;  %v1574_v58 = vld [vmem:[#allocation6 + $0x48] sm:$0xff]  }
  0x35   :  { %1438 = vmatprep.subr.bf16.mxu0 %v1563_v33  ;;  %v1299_v50 = vcombine.low %v113_v44, %v123_v47  ;;  %v327_v5 = vsel %vm1823_vm6, %v1315_v2, %v326_v62  ;;  %v516_v44 = vld [vmem:[#allocation2 + $0xc] sm:$0x1]  ;;  %vm1874_vm9 = vmand %vm510_vm7, %vm511_vm8  ;;  %vm519_vm10 = vsmask.f32 7938  ;;  %1462 = vmatprep.subr.bf16.mxu1 %v1573_v57  ;;  %v1578_v62 = vld [vmem:[#allocation6 + $0x68] sm:$0xff]   ;;  %vm581_vm13 = vcmask 1043456  }
  0x36   :  { %v330_v6 = vsel %vm1823_vm6, %v328_v3, %v329_v1  ;;  %v514_v47 = vsel %vm1874_vm9, 0, %v513_v43  ;;  %vm520_vm11 = vmand %vm510_vm7, %vm519_vm10  ;;  %1463 = vmatpush3.bf16.msra.mxu1 %v1573_v57  ;;  %v1885_v1 = vld [vmem:[#allocation6] sm:$0xff]   ;;  %vm539_vm12 = vsmask.f32 4368 }
  0x37   :  { %1435 = vmatmul.mubr.msk.bf16.vlgmr.msra.gmra.mrb[0].mxu0 %vm163_vm3, %v1299_v50  ;;  %v1317_v7 = vcombine.low %v327_v5, %v330_v6  ;;  %515 = vst [vmem:[#allocation2] sm:$0x1] %v514_v47  ;;  %v522_v50 = vsel %vm520_vm11, 0, %v521_v46  ;;  %1464 = vmatprep.subr.bf16.mxu1 %v1574_v58  ;;  %vm1903_vm14 = vmor %vm511_vm8, %vm539_vm12 }
  0x38   :  { %1439 = vmatpush3.bf16.msra.mxu0 %v1563_v33  ;;  %1446 = vmatprep.mubr.msk.bf16.mxu0 %vm163_vm3, %v1306_v49  ;;  %v524_v49 = vld [vmem:[#allocation2 + $0x14] sm:$0x1]  ;;  %523 = vst [vmem:[#allocation2 + $0x8] sm:$0x1] %v522_v50  ;;  %vm1908_vm15 = vmand %vm581_vm13, %vm519_vm10 }
  0x39   :  { %1440 = vmatprep.subr.bf16.mxu0 %v1564_v48  ;;  %v525_v52 = vsel %vm520_vm11, 0, %v524_v49 }
  0x3a   :  { %526 = vst [vmem:[#allocation2 + $0x14] sm:$0x1] %v525_v52  ;;  %1465 = vmatpush3.bf16.msra.mxu1 %v1574_v58 }
  0x3c   :  { %1441 = vmatpush3.bf16.msra.mxu0 %v1564_v48  ;;  %v517_v48 = vsel %vm1874_vm9, 0, %v516_v44 }
  0x3d   :  { %1442 = vmatprep.subr.bf16.mxu0 %v1565_v54  ;;  %518 = vst [vmem:[#allocation2 + $0xc] sm:$0x1] %v517_v48 }
  0x3e   :  { %v583_v44 = vld [vmem:[#allocation2] sm:$0xf] }
  0x3f   :  { %v587_v52 = vld [vmem:[#allocation2 + $0x8] sm:$0x1] }
  0x40   :  { %1443 = vmatpush3.bf16.msra.mxu0 %v1565_v54 }
  0x41   :  { %1444 = vmatprep.subr.bf16.mxu0 %v1566_v55  ;;  %v594_v58 = vld [vmem:[#allocation2 + $0x14] sm:$0x1] }
  0x44   :  { %1445 = vmatpush3.bf16.msra.mxu0 %v1566_v55  ;;  %v590_v57 = vld [vmem:[#allocation2 + $0xc] sm:$0xf] }
  0x45   :  { %1450 = vmatprep.subr.bf16.mxu0 %v1568_v56 }
  0x47   :  { %1447 = vmatmul.mubr.msk.bf16.vlgmr.msra.gmra.mrb[0].mxu0 %vm163_vm3, %v1307_v59  ;;  %v1575_v59 = vld [vmem:[#allocation6 + $0x50] sm:$0xff]  }
  0x48   :  { %1451 = vmatpush3.bf16.msra.mxu0 %v1568_v56  ;;  %1458 = vmatprep.mubr.msk.bf16.mxu0 %vm163_vm3, %v1316_v61  ;;  %v1577_v61 = vld [vmem:[#allocation6 + $0x60] sm:$0xff]  }
  0x49   :  { %1452 = vmatprep.subr.bf16.mxu0 %v1570_v60  ;;  %1466 = vmatprep.subr.bf16.mxu1 %v1575_v59 }
  0x4a   :  { %1467 = vmatpush3.bf16.msra.mxu1 %v1575_v59 }
  0x4c   :  { %1453 = vmatpush3.bf16.msra.mxu0 %v1570_v60  ;;  %v1576_v60 = vld [vmem:[#allocation6 + $0x58] sm:$0xff]  }
  0x4d   :  { %1454 = vmatprep.subr.bf16.mxu0 %v1571_v63  ;;  %1468 = vmatprep.subr.bf16.mxu1 %v1576_v60 }
  0x4e   :  { %1469 = vmatpush3.bf16.msra.mxu1 %v1576_v60 }
  0x4f   :  { %1470 = vmatprep.subr.bf16.mxu1 %v1577_v61 }
  0x50   :  { %1455 = vmatpush3.bf16.msra.mxu0 %v1571_v63  ;;  %v1579_v63 = vld [vmem:[#allocation6 + $0x70] sm:$0xff]  }
  0x51   :  { %1456 = vmatprep.subr.bf16.mxu0 %v1572_v4 }
  0x52   :  { %1471 = vmatpush3.bf16.msra.mxu1 %v1577_v61 }
  0x53   :  { %1472 = vmatprep.subr.bf16.mxu1 %v1578_v62 }
  0x54   :  { %1457 = vmatpush3.bf16.msra.mxu0 %v1572_v4 }
  0x56   :  { %1473 = vmatpush3.bf16.msra.mxu1 %v1578_v62 }
  0x57   :  { %1459 = vmatmul.mubr.msk.bf16.vlgmr.msra.gmra.mrb[0].mxu0 %vm163_vm3, %v1317_v7  ;;  %1474 = vmatprep.subr.bf16.mxu1 %v1579_v63 }
  0x5a   :  { %1475 = vmatpush3.bf16.msra.mxu1 %v1579_v63 }
  0x5b   :  { %1476 = vmatprep.subr.bf16.mxu1 %v1580_v0 }
  0x5e   :  { %1477 = vmatpush3.bf16.msra.mxu1 %v1580_v0 }
  0x5f   :  { %1482 = vmatprep.subr.bf16.mxu1 %v1885_v1 }
 0x12a   :  { %v1847_v8 = vpop.f32.mrb[0].mxu0 }
 0x12b   :  { %v1849_v9 = vpop.f32.mrb[1].mxu0  ;;  %v452_v15 = vmul.f32 %v1847_v8, %v1847_v8 }
 0x12c   :  { %v1851_v10 = vpop.f32.mrb[2].mxu0  ;;  %v450_v12 = vmul.f32 %v1849_v9, %v1849_v9 }
 0x12d   :  { %v1853_v11 = vpop.f32.mrb[3].mxu0  ;;  %v453_v18 = vmul.f32 %v1851_v10, %v1851_v10 }
 0x12e   :  { %v429_v13 = vadd.f32 %v1853_v11, %v1849_v9  ;;  %v451_v14 = vmul.f32 %v1853_v11, %v1853_v11 }
 0x130   :  { %v430_v16 = vadd.f32 %v1847_v8, %v429_v13  ;;  %v454_v17 = vadd.f32 %v451_v14, %v450_v12 }
 0x132   :  { %v455_v19 = vadd.f32 %v454_v17, %v452_v15  ;;  %v431_v20 = vadd.f32 %v1851_v10, %v430_v16  ;;  %v487_v15 = vlaneseq  ;;  %v479_v17 = vld [vmem:[%s2057_s2] sm:$0x1] }
 0x134   :  { %v456_v21 = vadd.f32 %v455_v19, %v453_v18  ;;  %v432_v22 = vrot.slane %v431_v20, 4  ;;  %v488_v16 = vshrl.u32 %v487_v15, 7 }
 0x136   :  { %v433_v23 = vadd.f32 %v432_v22, %v431_v20  ;;  %v457_v24 = vrot.slane %v456_v21, 4  ;;  %v1891_v18 = vsub.s32 0, %v488_v16 }
 0x138   :  { %v434_v26 = vrot.slane %v433_v23, 2  ;;  %v458_v27 = vadd.f32 %v457_v24, %v456_v21  ;;  %v483_v21 = vld [vmem:[%s2058_s3] sm:$0x1] }
 0x13a   :  { %v435_v28 = vadd.f32 %v434_v26, %v433_v23  ;;  %v459_v29 = vrot.slane %v458_v27, 2 }
 0x13c   :  { %v436_v30 = vrot.slane %v435_v28, 1  ;;  %v460_v31 = vadd.f32 %v459_v29, %v458_v27 }
 0x13e   :  { %v437_v32 = vadd.f32 %v436_v30, %v435_v28  ;;  %v461_v33 = vrot.slane %v460_v31, 1 }
 0x140   :  { %438 = vrot.lane.b32.xlu0 %v437_v32, %s1683_s24  ;;  %v462_v34 = vadd.f32 %v461_v33, %v460_v31 }
 0x144   :  { %463 = vrot.lane.b32.xlu0 %v462_v34, %s1683_s24 }
 0x1b2   :  { %v439_v35 = vpop.permute.xlu0 %438 }
 0x1b3   :  { %v440_v36 = vadd.f32 %v439_v35, %v437_v32 }
 0x1b5   :  { %441 = vrot.lane.b32.xlu1 %v440_v36, %s1684_s25 }
 0x1b6   :  { %v464_v37 = vpop.permute.xlu0 %463 }
 0x1b7   :  { %v465_v38 = vadd.f32 %v464_v37, %v462_v34 }
 0x1b9   :  { %466 = vrot.lane.b32.xlu1 %v465_v38, %s1684_s25 }
 0x227   :  { %v442_v39 = vpop.permute.xlu1 %441 }
 0x228   :  { %v443_v40 = vadd.f32 %v442_v39, %v440_v36 }
 0x22a   :  { %444 = vrot.lane.b32.xlu0 %v443_v40, %s1685_s26 }
 0x22b   :  { %v467_v41 = vpop.permute.xlu1 %466 }
 0x22c   :  { %v468_v42 = vadd.f32 %v467_v41, %v465_v38 }
 0x22e   :  { %469 = vrot.lane.b32.xlu1 %v468_v42, %s1685_s26 }
 0x29c   :  { %v445_v53 = vpop.permute.xlu0 %444 }
 0x29d   :  { %v446_v54 = vadd.f32 %v445_v53, %v443_v40 }
 0x29f   :  { %447 = vrot.lane.b32.xlu0 %v446_v54, %s1680_s15 }
 0x2a0   :  { %v470_v55 = vpop.permute.xlu1 %469 }
 0x2a1   :  { %v471_v56 = vadd.f32 %v470_v55, %v468_v42 }
 0x2a3   :  { %472 = vrot.lane.b32.xlu1 %v471_v56, %s1680_s15 }
 0x311   :  { %v448_v2 = vpop.permute.xlu0 %447 }
 0x312   :  { %v449_v3 = vadd.f32 %v448_v2, %v446_v54 }
 0x314   :  { %v475_v4 = vmul.f32 0.001953125, %v449_v3 }
 0x315   :  { %v473_v5 = vpop.permute.xlu1 %472 }
 0x316   :  { %v474_v6 = vadd.f32 %v473_v5, %v471_v56  ;;  %v477_v7 = vmul.f32 %v475_v4, %v475_v4 }
 0x318   :  { %v476_v12 = vmul.f32 0.001953125, %v474_v6 }
 0x31a   :  { %v478_v13 = vsub.f32 %v476_v12, %v477_v7 }
 0x31c   :  { %v480_v14 = vadd.f32 1e-05, %v478_v13 }
 0x31e   :  { %1603 = vrsqrt.f32 %v480_v14 }
 0x328   :  { %v1604_v19 = vpop.eup %1603 }
 0x329   :  { %v482_v20 = vmul.f32 %v1604_v19, %v479_v17 }
 0x32b   :  { %v484_v22 = vmul.f32 %v482_v20, %v475_v4  ;;  %v490_v23 = vrot.slane %v482_v20, %v1891_v18 }
 0x32d   :  { %v485_v24 = vsub.f32 %v483_v21, %v484_v22  ;;  %v492_v26 = vmul.f32 %v490_v23, %v1849_v9  ;;  %v493_v27 = vmul.f32 %v490_v23, %v1853_v11  ;;  %v494_v28 = vmul.f32 %v1847_v8, %v490_v23 }
 0x32e   :  { %v495_v29 = vmul.f32 %v1851_v10, %v490_v23 }
 0x32f   :  { %v500_v30 = vrot.slane %v485_v24, %v1891_v18 }
 0x331   :  { %v502_v31 = vadd.f32 %v500_v30, %v492_v26  ;;  %v503_v32 = vadd.f32 %v500_v30, %v493_v27  ;;  %v504_v33 = vadd.f32 %v500_v30, %v494_v28  ;;  %v505_v34 = vadd.f32 %v500_v30, %v495_v29 }
 0x333   :  { %v506_v35 = vmax.f32 %v502_v31, 0.0  ;;  %v507_v36 = vmax.f32 %v503_v32, 0.0  ;;  %v508_v37 = vmax.f32 %v504_v33, 0.0  ;;  %v509_v38 = vmax.f32 %v505_v34, 0.0 }
 0x335   :  { %v1368_v39 = vpack.c.bf16 %v506_v35, %v506_v35  ;;  %v1369_v40 = vpack.c.bf16 %v507_v36, %v507_v36  ;;  %v1370_v41 = vpack.c.bf16 %v508_v37, %v508_v37  ;;  %v1371_v9 = vpack.c.bf16 %v509_v38, %v509_v38 }
 0x337   :  { %v542_v11 = vshrl.u32 %v1368_v39, 16  ;;  %v550_v8 = vshrl.u32 %v1369_v40, 16  ;;  %v559_v42 = vshrl.u32 %v1370_v41, 16  ;;  %v567_v10 = vshrl.u32 %v1371_v9, 16 }
 0x338   :  { %v545_v47 = vshll.u32 %v1368_v39, 16  ;;  %v553_v49 = vshll.u32 %v1369_v40, 16  ;;  %v562_v54 = vshll.u32 %v1370_v41, 16  ;;  %v570_v56 = vshll.u32 %v1371_v9, 16 }
 0x339   :  { %v544_v46 = vrot.slane %v542_v11, 7  ;;  %v552_v48 = vrot.slane %v550_v8, 7  ;;  %v561_v53 = vrot.slane %v559_v42, 7  ;;  %v569_v55 = vrot.slane %v567_v10, 7 }
 0x33b   :  { %v547_v59 = vor.u32 %v545_v47, %v544_v46  ;;  %v548_v60 = vrot.slane %v544_v46, 4  ;;  %v555_v61 = vor.u32 %v553_v49, %v552_v48  ;;  %v557_v62 = vrot.slane %v552_v48, 4 }
 0x33c   :  { %v564_v63 = vor.u32 %v562_v54, %v561_v53  ;;  %v565_v0 = vrot.slane %v561_v53, 4  ;;  %v572_v2 = vor.u32 %v570_v56, %v569_v55  ;;  %v574_v3 = vrot.slane %v569_v55, 4 }
 0x33d   :  { %v556_v4 = vsel %vm1903_vm14, %v548_v60, %v555_v61  ;;  %v584_v5 = vsel %vm1908_vm15, %v547_v59, %v583_v44  ;;  %v588_v6 = vsel %vm1874_vm9, %v557_v62, %v587_v52 }
 0x33e   :  { %v573_v7 = vsel %vm1903_vm14, %v565_v0, %v572_v2  ;;  %586 = vst [vmem:[#allocation2 + $0x4] sm:$0xf] %v556_v4  ;;  %v591_v12 = vsel %vm1908_vm15, %v564_v63, %v590_v57  ;;  %v595_v13 = vsel %vm1874_vm9, %v574_v3, %v594_v58  ;;  %585 = vst [vmem:[#allocation2] sm:$0xf] %v584_v5  ;;  %v1583_v58 = vld [vmem:[#allocation6 + $0x8] sm:$0xff]   ;;  %v1584_v63 = vld [vmem:[#allocation6 + $0x10] sm:$0xff]  }
 0x33f   :  { %589 = vst [vmem:[#allocation2 + $0x8] sm:$0x1] %v588_v6  ;;  %592 = vst [vmem:[#allocation2 + $0xc] sm:$0xf] %v591_v12  ;;  %v1585_v0 = vld [vmem:[#allocation6 + $0x18] sm:$0xff]   ;;  %v1586_v2 = vld [vmem:[#allocation6 + $0x20] sm:$0xff]  }
 0x340   :  { %593 = vst [vmem:[#allocation2 + $0x10] sm:$0xf] %v573_v7  ;;  %596 = vst [vmem:[#allocation2 + $0x14] sm:$0x1] %v595_v13  ;;  %v1587_v3 = vld [vmem:[#allocation6 + $0x28] sm:$0xff]   ;;  %v1588_v4 = vld [vmem:[#allocation6 + $0x30] sm:$0xff]  }
 0x341   :  { %v1591_v13 = vld [vmem:[#allocation6 + $0x80] sm:$0xff]  }
 0x345   :  { %v597_v14 = vld [vmem:[#allocation2] sm:$0xf]  ;;  %v1924_v15 = vld [vmem:[#allocation2 + $0x4] sm:$0xf] }
 0x346   :  { %v1926_v16 = vld [vmem:[#allocation2 + $0x8] sm:$0x1]  ;;  %v620_v17 = vshrl.u32 %v597_v14, 16  ;;  %v623_v19 = vshll.u32 %v597_v14, 16  ;;  %v629_v20 = vshll.u32 %v1924_v15, 16  ;;  %v633_v21 = vshrl.u32 %v1924_v15, 16 }
 0x347   :  { %v1930_v22 = vld [vmem:[#allocation2 + $0xc] sm:$0xf]  ;;  %v639_v45 = vshll.u32 %v1926_v16, 16  ;;  %v1933_v23 = vld [vmem:[#allocation2 + $0x10] sm:$0xf]  ;;  %v1338_v59 = vcombine.low %v597_v14, %v1924_v15  ;;  %v906_v5 = vrot.slane %v1924_v15, 5 }
 0x348   :  { %v622_v24 = vrot.slane %v620_v17, 4  ;;  %v625_v26 = vrot.slane %v623_v19, 5  ;;  %v631_v27 = vrot.slane %v629_v20, 5  ;;  %v635_v28 = vrot.slane %v633_v21, 4  ;;  %v618_v29 = vld [vmem:[#allocation2 + $0x14] sm:$0x1] }
 0x349   :  { %v644_v30 = vshrl.u32 %v1930_v22, 16  ;;  %v647_v31 = vshll.u32 %v1930_v22, 16  ;;  %v653_v32 = vshll.u32 %v1933_v23, 16  ;;  %v657_v35 = vshrl.u32 %v1933_v23, 16  ;;  %v899_v42 = vld [vmem:[#allocation2 + $0xc] sm:$0xe] }
 0x34a   :  { %v626_v33 = vor.u32 %v625_v26, %v622_v24  ;;  %v636_v34 = vor.u32 %v635_v28, %v631_v27  ;;  %v641_v36 = vrot.slane %v639_v45, 5  ;;  %v663_v11 = vshll.u32 %v618_v29, 16  ;;  %v898_v6 = vld [vmem:[#allocation2] sm:$0xe]  ;;  %v1594_v45 = vld [vmem:[#allocation6 + $0x98] sm:$0xff]   ;;  %v1595_v24 = vld [vmem:[#allocation6 + $0xa0] sm:$0xff]  }
 0x34b   :  { %v646_v37 = vrot.slane %v644_v30, 4  ;;  %v649_v38 = vrot.slane %v647_v31, 5  ;;  %v655_v39 = vrot.slane %v653_v32, 5  ;;  %v659_v9 = vrot.slane %v657_v35, 4  ;;  %v1592_v20 = vld [vmem:[#allocation6 + $0x88] sm:$0xff]  }
 0x34c   :  { %v627_v40 = vrot.slane %v626_v33, 4  ;;  %v637_v41 = vrot.slane %v636_v34, 4  ;;  %v665_v49 = vrot.slane %v663_v11, 5  ;;  %v1349_v50 = vrot.slane %v899_v42, 9 }
 0x34d   :  { %v650_v8 = vor.u32 %v649_v38, %v646_v37  ;;  %v660_v44 = vor.u32 %v659_v9, %v655_v39  ;;  %v913_v52 = vrot.slane %v1933_v23, 5  ;;  %v916_v55 = vrot.slane %v618_v29, 5 }
 0x34e   :  { %v632_v10 = vsel %vm1801_vm2, %v627_v40, %v631_v27  ;;  %v642_v43 = vsel %vm1801_vm2, %v637_v41, %v641_v36  ;;  %v908_v7 = vrot.slane %v906_v5, 4  ;;  %v909_v12 = vrot.slane %v1926_v16, 5  ;;  %v1593_v16 = vld [vmem:[#allocation6 + $0x90] sm:$0xff]  }
 0x34f   :  { %v1328_v46 = vcombine.low %v632_v10, %v642_v43  ;;  %v651_v47 = vrot.slane %v650_v8, 4  ;;  %v661_v48 = vrot.slane %v660_v44, 4  ;;  %v915_v56 = vrot.slane %v913_v52, 4 }
 0x350   :  { %v914_v60 = vsel %vm1823_vm6, %v1349_v50, %v913_v52  ;;  %v1348_v14 = vrot.slane %v898_v6, 9  ;;  %v910_v17 = vsel %vm1823_vm6, %v908_v7, %v909_v12  ;;  %v1339_v19 = vcombine.low %v1930_v22, %v1933_v23  ;;  %v1596_v22 = vld [vmem:[#allocation6 + $0xa8] sm:$0xff]   ;;  %v1598_v23 = vld [vmem:[#allocation6 + $0xb8] sm:$0xff]   ;;  %v1600_v50 = vld [vmem:[%s2062_s7 + $0x8] sm:$0xff]  }
 0x351   :  { %1478 = vmatprep.mubr.bf16.mxu1 %v1328_v46  ;;  %v656_v53 = vsel %vm1801_vm2, %v651_v47, %v655_v39  ;;  %v666_v54 = vsel %vm1801_vm2, %v661_v48, %v665_v49  ;;  %v917_v61 = vsel %vm1823_vm6, %v915_v56, %v916_v55  ;;  %v1599_v49 = vld [vmem:[%s2062_s7] sm:$0xff]  }
 0x352   :  { %v1329_v57 = vcombine.low %v656_v53, %v666_v54  ;;  %v1351_v62 = vcombine.low %v914_v60, %v917_v61  ;;  %v907_v15 = vsel %vm1823_vm6, %v1348_v14, %v906_v5  ;;  %v1121_v52 = vld [vmem:[%s2055_s0] sm:$0xf]  ;;  %v1122_v53 = vld [vmem:[%s2055_s0 + $0x4] sm:$0xf]  ;;  %1522 = vmatprep.subr.bf16.mxu0 %v1599_v49  ;;  %v1123_v54 = vld [vmem:[%s2055_s0 + $0x8] sm:$0x1] }
 0x353   :  { %v1350_v21 = vcombine.low %v907_v15, %v910_v17  ;;  %v1128_v55 = vshrl.u32 %v1121_v52, 16  ;;  %v1131_v56 = vshll.u32 %v1121_v52, 16  ;;  %1523 = vmatpush3.bf16.msra.mxu0 %v1599_v49  ;;  %v1147_v60 = vshll.u32 %v1123_v54, 16  ;;  %v1124_v61 = vld [vmem:[%s2055_s0 + $0xc] sm:$0xf] }
 0x354   :  { %1479 = vmatmul.mubr.bf16.vlgmr.msra.gmra.mrb[0].mxu1 %v1329_v57  ;;  %v1137_v57 = vshll.u32 %v1122_v53, 16  ;;  %1524 = vmatprep.subr.bf16.mxu0 %v1600_v50  ;;  %v1155_v6 = vshll.u32 %v1124_v61, 16 }
 0x355   :  { %1483 = vmatpush3.bf16.msra.mxu1 %v1885_v1  ;;  %1498 = vmatprep.mubr.bf16.mxu1 %v1338_v59  ;;  %v1589_v1 = vld [vmem:[#allocation6 + $0x38] sm:$0xff]   ;;  %v1149_v5 = vrot.slane %v1147_v60, 5  ;;  %v1094_v60 = vld [vmem:[%s2060_s5] sm:$0x1]  ;;  %s1686_s5 = smov [#allocation8]  }
 0x356   :  { %1484 = vmatprep.subr.bf16.mxu1 %v1583_v58  ;;  %v1601_v59 = vld [vmem:[%s2062_s7 + $0x10] sm:$0xff]  }
 0x357   :  { %1525 = vmatpush3.bf16.msra.mxu0 %v1600_v50 }
 0x358   :  { %1526 = vmatprep.subr.bf16.mxu0 %v1601_v59 }
 0x359   :  { %1485 = vmatpush3.bf16.msra.mxu1 %v1583_v58  ;;  %v1141_v58 = vshrl.u32 %v1122_v53, 16 }
 0x35a   :  { %1486 = vmatprep.subr.bf16.mxu1 %v1584_v63 }
 0x35b   :  { %1527 = vmatpush3.bf16.msra.mxu0 %v1601_v59 }
 0x35d   :  { %1487 = vmatpush3.bf16.msra.mxu1 %v1584_v63  ;;  %v1130_v63 = vrot.slane %v1128_v55, 4 }
 0x35e   :  { %1488 = vmatprep.subr.bf16.mxu1 %v1585_v0 }
 0x361   :  { %1489 = vmatpush3.bf16.msra.mxu1 %v1585_v0  ;;  %v1133_v0 = vrot.slane %v1131_v56, 5 }
 0x362   :  { %1490 = vmatprep.subr.bf16.mxu1 %v1586_v2 }
 0x365   :  { %1491 = vmatpush3.bf16.msra.mxu1 %v1586_v2  ;;  %v1139_v2 = vrot.slane %v1137_v57, 5 }
 0x366   :  { %1492 = vmatprep.subr.bf16.mxu1 %v1587_v3 }
 0x369   :  { %1493 = vmatpush3.bf16.msra.mxu1 %v1587_v3  ;;  %v1143_v3 = vrot.slane %v1141_v58, 4 }
 0x36a   :  { %1494 = vmatprep.subr.bf16.mxu1 %v1588_v4 }
 0x36b   :  { %v1144_v14 = vor.u32 %v1143_v3, %v1139_v2 }
 0x36d   :  { %1495 = vmatpush3.bf16.msra.mxu1 %v1588_v4  ;;  %v1126_v4 = vld [vmem:[%s2055_s0 + $0x14] sm:$0x1] }
 0x36e   :  { %1496 = vmatprep.subr.bf16.mxu1 %v1589_v1 }
 0x371   :  { %1497 = vmatpush3.bf16.msra.mxu1 %v1589_v1  ;;  %v1152_v1 = vshrl.u32 %v1124_v61, 16 }
 0x372   :  { %1502 = vmatprep.subr.bf16.mxu1 %v1591_v13 }
 0x374   :  { %1499 = vmatmul.mubr.bf16.vlgmr.msra.gmra.mrb[0].mxu1 %v1339_v19  ;;  %v1171_v19 = vshll.u32 %v1126_v4, 16 }
 0x375   :  { %1503 = vmatpush3.bf16.msra.mxu1 %v1591_v13  ;;  %1518 = vmatprep.mubr.bf16.mxu1 %v1350_v21  ;;  %v1134_v13 = vor.u32 %v1133_v0, %v1130_v63  ;;  %v1157_v21 = vrot.slane %v1155_v6, 5  ;;  %v1098_v63 = vld [vmem:[%s2061_s6] sm:$0x1]  ;;  %s1285_s6 = sshll.u32 %s1686_s5, 4  ;;  %s1286_s6 = int_to_ptr.vmem [resolvable:$true] %s1285_s6 }
 0x376   :  { %1504 = vmatprep.subr.bf16.mxu1 %v1592_v20  ;;  %p1656_p3 = scmp.lt.s32.totalorder %s1286_s6, %s1286_s6 }
 0x379   :  { %1505 = vmatpush3.bf16.msra.mxu1 %v1592_v20  ;;  %v1154_v20 = vrot.slane %v1152_v1, 4 }
 0x37a   :  { %1506 = vmatprep.subr.bf16.mxu1 %v1593_v16 }
 0x37d   :  { %1507 = vmatpush3.bf16.msra.mxu1 %v1593_v16 }
 0x37e   :  { %1508 = vmatprep.subr.bf16.mxu1 %v1594_v45 }
 0x381   :  { %1509 = vmatpush3.bf16.msra.mxu1 %v1594_v45 }
 0x382   :  { %1510 = vmatprep.subr.bf16.mxu1 %v1595_v24 }
 0x385   :  { %1511 = vmatpush3.bf16.msra.mxu1 %v1595_v24  ;;  %v1602_v24 = vld [vmem:[%s2062_s7 + $0x18] sm:$0xff]  }
 0x386   :  { %1512 = vmatprep.subr.bf16.mxu1 %v1596_v22  ;;  %1528 = vmatprep.subr.bf16.mxu0 %v1602_v24 }
 0x387   :  { %1529 = vmatpush3.bf16.msra.mxu0 %v1602_v24 }
 0x389   :  { %1513 = vmatpush3.bf16.msra.mxu1 %v1596_v22  ;;  %v1135_v22 = vrot.slane %v1134_v13, 4 }
 0x38a   :  { %1514 = vmatprep.subr.bf16.mxu1 %v1597_v51 }
 0x38d   :  { %1515 = vmatpush3.bf16.msra.mxu1 %v1597_v51  ;;  %v1145_v51 = vrot.slane %v1144_v14, 4 }
 0x38e   :  { %1516 = vmatprep.subr.bf16.mxu1 %v1598_v23 }
 0x391   :  { %1517 = vmatpush3.bf16.msra.mxu1 %v1598_v23 }
 0x394   :  { %1519 = vmatmul.mubr.bf16.vlgmr.msra.gmra.mrb[0].mxu1 %v1351_v62  ;;  %v1125_v62 = vld [vmem:[%s2055_s0 + $0x10] sm:$0xf] }
 0x395   :  { %v1161_v7 = vshll.u32 %v1125_v62, 16  ;;  %v1165_v17 = vshrl.u32 %v1125_v62, 16 }
 0x397   :  { %v1163_v16 = vrot.slane %v1161_v7, 5  ;;  %v1167_v23 = vrot.slane %v1165_v17, 4 }
 0x467   :  { %v1962_v26 = vpop.f32.mrb[0].mxu1 }
 0x468   :  { %v1964_v27 = vpop.f32.mrb[1].mxu1  ;;  %v1067_v33 = vmul.f32 %v1962_v26, %v1962_v26 }
 0x469   :  { %v1966_v28 = vpop.f32.mrb[2].mxu1  ;;  %v1065_v30 = vmul.f32 %v1964_v27, %v1964_v27 }
 0x46a   :  { %v1968_v29 = vpop.f32.mrb[3].mxu1  ;;  %v1068_v36 = vmul.f32 %v1966_v28, %v1966_v28 }
 0x46b   :  { %v1044_v31 = vadd.f32 %v1968_v29, %v1964_v27  ;;  %v1066_v32 = vmul.f32 %v1968_v29, %v1968_v29 }
 0x46d   :  { %v1045_v34 = vadd.f32 %v1962_v26, %v1044_v31  ;;  %v1069_v35 = vadd.f32 %v1066_v32, %v1065_v30  ;;  %v1158_v31 = vor.u32 %v1157_v21, %v1154_v20  ;;  %v1140_v32 = vsel %vm1801_vm2, %v1135_v22, %v1139_v2 }
 0x46f   :  { %v1046_v37 = vadd.f32 %v1966_v28, %v1045_v34  ;;  %v1070_v38 = vadd.f32 %v1069_v35, %v1067_v33  ;;  %v1150_v33 = vsel %vm1801_vm2, %v1145_v51, %v1149_v5  ;;  %v1168_v34 = vor.u32 %v1167_v23, %v1163_v16 }
 0x470   :  { %v1173_v35 = vrot.slane %v1171_v19, 5 }
 0x471   :  { %v1047_v39 = vrot.slane %v1046_v37, 4  ;;  %v1071_v40 = vadd.f32 %v1070_v38, %v1068_v36  ;;  %v1360_v36 = vcombine.low %v1140_v32, %v1150_v33  ;;  %v1169_v38 = vrot.slane %v1168_v34, 4 }
 0x473   :  { %v1048_v41 = vadd.f32 %v1047_v39, %v1046_v37  ;;  %v1072_v9 = vrot.slane %v1071_v40, 4  ;;  %v1159_v37 = vrot.slane %v1158_v31, 4  ;;  %1530 = vmatprep.mubr.msk.bf16.mxu0 %vm163_vm3, %v1360_v36 }
 0x475   :  { %v1049_v11 = vrot.slane %v1048_v41, 2  ;;  %v1073_v8 = vadd.f32 %v1072_v9, %v1071_v40  ;;  %v1164_v39 = vsel %vm1801_vm2, %v1159_v37, %v1163_v16  ;;  %v1174_v40 = vsel %vm1801_vm2, %v1169_v38, %v1173_v35 }
 0x477   :  { %v1050_v42 = vadd.f32 %v1049_v11, %v1048_v41  ;;  %v1074_v10 = vrot.slane %v1073_v8, 2  ;;  %v1361_v41 = vcombine.low %v1164_v39, %v1174_v40 }
 0x479   :  { %v1051_v43 = vrot.slane %v1050_v42, 1  ;;  %v1075_v44 = vadd.f32 %v1074_v10, %v1073_v8  ;;  %1531 = vmatmul.mubr.msk.bf16.vlgmr.msra.gmra.mrb[4].mxu0 %vm163_vm3, %v1361_v41 }
 0x47b   :  { %v1052_v46 = vadd.f32 %v1051_v43, %v1050_v42  ;;  %v1076_v47 = vrot.slane %v1075_v44, 1 }
 0x47d   :  { %1053 = vrot.lane.b32.xlu0 %v1052_v46, %s1683_s24  ;;  %v1077_v48 = vadd.f32 %v1076_v47, %v1075_v44 }
 0x47f   :  { %1078 = vrot.lane.b32.xlu1 %v1077_v48, %s1683_s24 }
 0x4ef   :  { %v1054_v12 = vpop.permute.xlu0 %1053 }
 0x4f0   :  { %v1055_v15 = vadd.f32 %v1054_v12, %v1052_v46 }
 0x4f1   :  { %v1079_v45 = vpop.permute.xlu1 %1078 }
 0x4f2   :  { %v1080_v30 = vadd.f32 %v1079_v45, %v1077_v48  ;;  %1056 = vrot.lane.b32.xlu0 %v1055_v15, %s1684_s25 }
 0x4f4   :  { %1081 = vrot.lane.b32.xlu1 %v1080_v30, %s1684_s25 }
 0x54c   :  { %v1532_v25 = vpop.f32.mrb[4].mxu0 }
 0x54d   :  { %v1253_v47 = vpop.f32.mrb[5].mxu0 }
 0x54e   :  { %v1533_v48 = vpop.f32.mrb[6].mxu0 }
 0x54f   :  { %v1256_v49 = vpop.f32.mrb[7].mxu0 }
 0x564   :  { %v1057_v9 = vpop.permute.xlu0 %1056 }
 0x565   :  { %v1058_v11 = vadd.f32 %v1057_v9, %v1055_v15 }
 0x566   :  { %v1082_v8 = vpop.permute.xlu1 %1081 }
 0x567   :  { %v1083_v42 = vadd.f32 %v1082_v8, %v1080_v30  ;;  %1059 = vrot.lane.b32.xlu0 %v1058_v11, %s1685_s26 }
 0x569   :  { %1084 = vrot.lane.b32.xlu1 %v1083_v42, %s1685_s26  ;;  %s1651_s26 = scalar_lea.vmem %s1286_s6, 512 }
 0x56a   :  { %p1652_p2 = scmp.ne.s32.totalorder %s1286_s6, %s1651_s26  ;;  %p1657_p4 = scmp.lt.s32.totalorder %s1651_s26, %s1651_s26 }
 0x56c   :  { %p1658_p5 = por %p1657_p4, %p1656_p3 }
 0x56e   :  { %p1659_p6 = pnand %p1658_p5, %p1652_p2 }
 0x5d9   :  { %v1060_v10 = vpop.permute.xlu0 %1059 }
 0x5da   :  { %v1061_v43 = vadd.f32 %v1060_v10, %v1058_v11 }
 0x5db   :  { %v1085_v44 = vpop.permute.xlu1 %1084 }
 0x5dc   :  { %v1086_v46 = vadd.f32 %v1085_v44, %v1083_v42  ;;  %1062 = vrot.lane.b32.xlu0 %v1061_v43, %s1680_s15 }
 0x5de   :  { %1087 = vrot.lane.b32.xlu1 %v1086_v46, %s1680_s15 }
 0x64e   :  { %v1063_v50 = vpop.permute.xlu0 %1062 }
 0x64f   :  { %v1064_v52 = vadd.f32 %v1063_v50, %v1061_v43 }
 0x650   :  { %v1088_v53 = vpop.permute.xlu1 %1087 }
 0x651   :  { %v1090_v54 = vmul.f32 0.001953125, %v1064_v52  ;;  %v1089_v55 = vadd.f32 %v1088_v53, %v1086_v46 }
 0x653   :  { %v1092_v56 = vmul.f32 %v1090_v54, %v1090_v54  ;;  %v1091_v57 = vmul.f32 0.001953125, %v1089_v55 }
 0x655   :  { %v1093_v58 = vsub.f32 %v1091_v57, %v1092_v56 }
 0x657   :  { %v1095_v59 = vadd.f32 1e-05, %v1093_v58 }
 0x659   :  { %1605 = vrsqrt.f32 %v1095_v59 }
 0x663   :  { %v1606_v61 = vpop.eup %1605 }
 0x664   :  { %v1097_v62 = vmul.f32 %v1606_v61, %v1094_v60 }
 0x666   :  { %v1099_v0 = vmul.f32 %v1097_v62, %v1090_v54  ;;  %v1105_v2 = vrot.slane %v1097_v62, %v1891_v18 }
 0x668   :  { %v1100_v3 = vsub.f32 %v1098_v63, %v1099_v0  ;;  %v1109_v4 = vmul.f32 %v1962_v26, %v1105_v2  ;;  %v1107_v1 = vmul.f32 %v1105_v2, %v1964_v27  ;;  %v1110_v6 = vmul.f32 %v1966_v28, %v1105_v2 }
 0x669   :  { %v1108_v7 = vmul.f32 %v1105_v2, %v1968_v29 }
 0x66a   :  { %v1115_v5 = vrot.slane %v1100_v3, %v1891_v18 }
 0x66c   :  { %v1119_v12 = vadd.f32 %v1115_v5, %v1109_v4  ;;  %v1117_v13 = vadd.f32 %v1115_v5, %v1107_v1  ;;  %v1120_v14 = vadd.f32 %v1115_v5, %v1110_v6  ;;  %v1118_v17 = vadd.f32 %v1115_v5, %v1108_v7 }
 0x66e   :  { %v1270_v19 = vadd.f32 %v1532_v25, %v1119_v12  ;;  %v1268_v15 = vadd.f32 %v1253_v47, %v1117_v13  ;;  %v1271_v20 = vadd.f32 %v1533_v48, %v1120_v14  ;;  %v1269_v21 = vadd.f32 %v1256_v49, %v1118_v17 }
 0x670   :  { %v1274_v16 = vmax.f32 %v1270_v19, 0.0  ;;  %v1272_v26 = vmax.f32 %v1268_v15, 0.0  ;;  %v1275_v45 = vmax.f32 %v1271_v20, 0.0  ;;  %v1273_v18 = vmax.f32 %v1269_v21, 0.0 }
 0x672   :  { %1278 = vst [vmem:[#allocation8 + $0x10] sm:$0xff] %v1274_v16  ;;  %1276 = vst [vmem:[#allocation8] sm:$0xff] %v1272_v26 }
 0x673   :  { %1279 = vst [vmem:[#allocation8 + $0x18] sm:$0xff] %v1275_v45  ;;  %1277 = vst [vmem:[#allocation8 + $0x8] sm:$0xff] %v1273_v18 }
 0x674   :  { %1662 = shalt.err (!%p1659_p6)
}
 0x675   :  { %s1663_s2 = scalar_lea.hbm %s2063_s8, 512 }
 0x676   :  { %p1664_p7 = scmp.ne.s32.totalorder %s2063_s8, %s1663_s2  ;;  %p1667_p8 = scmp.lt.u32.totalorder %s1663_s2, %s2063_s8 }
 0x678   :  { %p1669_p9 = pnand %p1667_p8, %p1664_p7 }
 0x67a   :  { %1672 = shalt.err (!%p1669_p9)
}
 0x67b   :  { %s1687_s11 = smov 128  }
 0x67c   :  { %1291 = dma.vmem_to_hbm [thread:$0]  %s1286_s6, 512, %s2063_s8, [#allocation5], %s1687_s11, %s1687_s11, %s1683_s24  }
 0x67d   :  { %1677 = dma.done.wait [#allocation5], 512  }
 0x67e   :  { %1678 = vsyncadd [#allocation5], 4294966784 }
 0x67f   :  { %1295 = vsyncpa [#allocation4], 1 }
 0x680   :  { %1296 = vsyncpa [#allocation7], 1 }
 0x681   :  { %1297 = vsyncpa [#allocation5], 1 }

</bundles_post_ra>
